<compile_context>
chip_gen: v5e
topology: v5e:2x2
jax: 0.10.0
libtpu: 0.0.40
codegen_flags: <defaults>
</compile_context>

<pallas_src>
import numpy as np
import jax
import jax.numpy as jnp
from jax.experimental import pallas as pl
from jax.experimental.pallas import tpu as pltpu

# ---- problem constants (mirroring the module's __init__ arguments) ----------
P = 5            # number of assets -> Linear(5, ...) forces P == 5
HIDDEN = 50
PAD = 64         # padded weight dim: >= HIDDEN, multiple of bf16 sublane pack (16)
BATCH = 8
LB = 0.0         # lb
UB = 0.5         # ub
RF = 1.03        # Rf
R_DRIFT = 0.02   # r
DELTA = 1.0 / 12 # Delta

# Rebalance bound: softmax weights sum to ~1, so at most floor(1/UB) assets can
# ever be pinned at UB; every non-terminal pass pins at least one more asset,
# so ceil(1/UB) reassignment passes + one fixed-point pass is a static bound.
REBAL_ITERS = 3
assert LB == 0.0, "kernel assumes lb == 0 (lower bound never binds)"
assert REBAL_ITERS >= int(np.ceil(1.0 / UB)) + 1, "REBAL_ITERS too small for UB"


def subnetwork_kernel(rx_ref, w_ref, out_ref):
    rx = rx_ref[...]                                  # (B, PAD) f32
    rx_bf = rx.astype(jnp.bfloat16)

    # ----- nn.Sequential: 5x (Linear no-bias + Tanh), bf16 MXU / f32 acc ------
    # Weight pads are zero, so the padded lanes (including the x column, which
    # only hits zero rows of w_ref[0]) stay exactly zero through every layer.
    h = jnp.tanh(jnp.dot(rx_bf, w_ref[0], preferred_element_type=jnp.float32))
    for layer in (1, 2, 3, 4):
        h = jnp.tanh(jnp.dot(h.astype(jnp.bfloat16), w_ref[layer],
                             preferred_element_type=jnp.float32))

    # ----- Softmax(dim=1) over the first P logits ------------------------------
    # tanh output is in [-1, 1], so exp() cannot overflow and the usual
    # max-subtraction is dropped (one fewer cross-lane reduction).
    e = jnp.exp(h[:, :P])                             # (B, P) f32
    weights = e * pl.reciprocal(jnp.sum(e, axis=1, keepdims=True), approx=True)

    # ----- rebalance(): vectorized per-row emulation of the while-loop --------
    # Carried state: `new` (in [lb, ub] on entry) and `leftover`
    # (= sum(old - new) of the PyTorch loop).  A finished row has
    # leftover == 0 and is a fixed point, so extra unrolled passes are no-ops
    # and the returned value matches PyTorch's (unclipped) break value.
    new = jnp.clip(weights, LB, UB)                   # (B, P)
    leftover = jnp.sum(weights - new, axis=1, keepdims=True)
    for _ in range(REBAL_ITERS):
        masked_new = jnp.where(new != UB, new, 0.0)   # exact torch `new != ub`
        denom = jnp.sum(masked_new, axis=1, keepdims=True)
        # denom > 0 is provable for UB = 0.5 (softmax weights are strictly
        # positive, at most 2 assets pin); the max() only avoids a 0-divide in
        # an unreachable case where PyTorch itself would produce NaN/inf.
        inv_denom = pl.reciprocal(jnp.maximum(denom, 1e-30), approx=True)
        new2 = new + leftover * inv_denom * masked_new
        clipped = jnp.clip(new2, LB, UB)
        leftover = jnp.sum(new2 - clipped, axis=1, keepdims=True)
        new = clipped

    # ----- updated_state[i] = sum(x[i] * output[i] * (1 + R[i]) * Rf) ---------
    R = rx[:, :P]                                     # (B, P)
    x_rf = rx[:, P:P + 1] * RF                        # (B, 1)
    out_ref[...] = jnp.sum(x_rf * new * (1.0 + R), axis=1, keepdims=True)


# ---------------------------- init-time packing -------------------------------
def pack_weights(w1, w2, w3, w4, w5, pad=PAD):
    """Zero-pad each (in, out) weight to (pad, pad), stack, cast to bf16. Once."""
    def padw(w):
        return jnp.zeros((pad, pad), jnp.float32).at[:w.shape[0], :w.shape[1]].set(w)
    return jnp.stack([padw(w1), padw(w2), padw(w3), padw(w4), padw(w5)]
                     ).astype(jnp.bfloat16)


def pack_returns(R, pad=PAD):
    """Place self.R in cols 0:P of a (B, pad) f32 slab; col P is reserved for x."""
    B = R.shape[0]
    return jnp.zeros((B, pad), jnp.float32).at[:, :R.shape[1]].set(
        R.astype(jnp.float32))


# ------------------------------ per-call path ---------------------------------
@jax.jit
def subnetwork_forward(x, rx_template, wpack):
    B = rx_template.shape[0]
    rx = rx_template.at[:, P].set(x.astype(jnp.float32))   # append x as a column
    vmem = pl.BlockSpec(memory_space=pltpu.MemorySpace.VMEM)
    out = pl.pallas_call(
        subnetwork_kernel,
        out_shape=jax.ShapeDtypeStruct((B, 1), jnp.float32),
        in_specs=[vmem, vmem],
        out_specs=vmem,
    )(rx, wpack)
    return out[:, 0]                                        # (B,)


def _uniform(key, shape, fan_in):
    bound = 1.0 / np.sqrt(fan_in)
    return jax.random.uniform(key, shape, jnp.float32, -bound, bound)


if __name__ == "__main__":
    key = jax.random.PRNGKey(0)
    k_eps, k_x, k1, k2, k3, k4, k5 = jax.random.split(key, 7)

    # ----- deterministic construction of self.R (the __init__ randomness) -----
    cov = (0.20 * jnp.eye(P) + 0.02 * jnp.ones((P, P))).astype(jnp.float32)
    Lambda = jnp.linspace(0.1, 0.5, P, dtype=jnp.float32)
    eps = jax.random.normal(k_eps, (BATCH, P), jnp.float32)    # ~ N(0, I_P)
    drift = (R_DRIFT * jnp.ones(P)
             + cov @ Lambda
             - 0.5 * jnp.diag(cov @ cov.T)) * DELTA            # (P,)
    diffusion = jnp.sqrt(DELTA) * (eps @ cov.T)                # (B, P)
    R = (jnp.exp(drift[None, :] + diffusion) - RF).astype(jnp.float32)

    # ----- deterministic MLP weights (stored as (in, out)) --------------------
    w1 = _uniform(k1, (P, HIDDEN), P)
    w2 = _uniform(k2, (HIDDEN, HIDDEN), HIDDEN)
    w3 = _uniform(k3, (HIDDEN, HIDDEN), HIDDEN)
    w4 = _uniform(k4, (HIDDEN, HIDDEN), HIDDEN)
    w5 = _uniform(k5, (HIDDEN, P), HIDDEN)

    # ----- one-time packing (kept out of the per-call path) -------------------
    wpack = jax.block_until_ready(pack_weights(w1, w2, w3, w4, w5))
    rx_template = jax.block_until_ready(pack_returns(R))

    # ----- per-batch scalar state variable x -----------------------------------
    x = jax.random.uniform(k_x, (BATCH,), jnp.float32, 0.5, 1.5)

    updated_state = subnetwork_forward(x, rx_template, wpack)
    updated_state = jax.block_until_ready(updated_state)
    assert updated_state.shape == (BATCH,)
    assert bool(jnp.all(jnp.isfinite(updated_state)))
    print("KERNEL_OK")
</pallas_src>

<mosaic_0001>
module attributes {stable_mosaic.version = 11 : i64} {
  func.func @subnetwork_kernel(%arg0: memref<8x64xf32, #tpu.memory_space<vmem>>, %arg1: memref<5x64x64xbf16, #tpu.memory_space<vmem>>, %arg2: memref<8x1xf32, #tpu.memory_space<vmem>>) attributes {dimension_semantics = [], scalar_prefetch = 0 : i64, scratch_operands = 0 : i64, tpu.core_type = #tpu.core_type<tc>} {
    %c0 = arith.constant 0 : index
    %c0_0 = arith.constant 0 : index
    %0 = vector.load %arg0[%c0, %c0_0] : memref<8x64xf32, #tpu.memory_space<vmem>>, vector<8x64xf32>
    %1 = arith.truncf %0 : vector<8x64xf32> to vector<8x64xbf16>
    %c0_1 = arith.constant 0 : index
    %c0_2 = arith.constant 0 : index
    %c0_3 = arith.constant 0 : index
    %2 = vector.load %arg1[%c0_1, %c0_2, %c0_3] : memref<5x64x64xbf16, #tpu.memory_space<vmem>>, vector<1x64x64xbf16>
    %3 = vector.shape_cast %2 : vector<1x64x64xbf16> to vector<64x64xbf16>
    %cst = arith.constant dense<0.000000e+00> : vector<8x64xf32>
    %4 = tpu.matmul %1, %3, %cst {dimension_numbers = #tpu.dot_dimension_numbers<[1], [0], [0], [1], [0, 0, 1, 1], [], []>} : vector<8x64xbf16>, vector<64x64xbf16>, vector<8x64xf32> -> vector<8x64xf32>
    %5 = math.tanh %4 : vector<8x64xf32>
    %6 = arith.truncf %5 : vector<8x64xf32> to vector<8x64xbf16>
    %c1 = arith.constant 1 : index
    %c0_4 = arith.constant 0 : index
    %c0_5 = arith.constant 0 : index
    %7 = vector.load %arg1[%c1, %c0_4, %c0_5] : memref<5x64x64xbf16, #tpu.memory_space<vmem>>, vector<1x64x64xbf16>
    %8 = vector.shape_cast %7 : vector<1x64x64xbf16> to vector<64x64xbf16>
    %cst_6 = arith.constant dense<0.000000e+00> : vector<8x64xf32>
    %9 = tpu.matmul %6, %8, %cst_6 {dimension_numbers = #tpu.dot_dimension_numbers<[1], [0], [0], [1], [0, 0, 1, 1], [], []>} : vector<8x64xbf16>, vector<64x64xbf16>, vector<8x64xf32> -> vector<8x64xf32>
    %10 = math.tanh %9 : vector<8x64xf32>
    %11 = arith.truncf %10 : vector<8x64xf32> to vector<8x64xbf16>
    %c2 = arith.constant 2 : index
    %c0_7 = arith.constant 0 : index
    %c0_8 = arith.constant 0 : index
    %12 = vector.load %arg1[%c2, %c0_7, %c0_8] : memref<5x64x64xbf16, #tpu.memory_space<vmem>>, vector<1x64x64xbf16>
    %13 = vector.shape_cast %12 : vector<1x64x64xbf16> to vector<64x64xbf16>
    %cst_9 = arith.constant dense<0.000000e+00> : vector<8x64xf32>
    %14 = tpu.matmul %11, %13, %cst_9 {dimension_numbers = #tpu.dot_dimension_numbers<[1], [0], [0], [1], [0, 0, 1, 1], [], []>} : vector<8x64xbf16>, vector<64x64xbf16>, vector<8x64xf32> -> vector<8x64xf32>
    %15 = math.tanh %14 : vector<8x64xf32>
    %16 = arith.truncf %15 : vector<8x64xf32> to vector<8x64xbf16>
    %c3 = arith.constant 3 : index
    %c0_10 = arith.constant 0 : index
    %c0_11 = arith.constant 0 : index
    %17 = vector.load %arg1[%c3, %c0_10, %c0_11] : memref<5x64x64xbf16, #tpu.memory_space<vmem>>, vector<1x64x64xbf16>
    %18 = vector.shape_cast %17 : vector<1x64x64xbf16> to vector<64x64xbf16>
    %cst_12 = arith.constant dense<0.000000e+00> : vector<8x64xf32>
    %19 = tpu.matmul %16, %18, %cst_12 {dimension_numbers = #tpu.dot_dimension_numbers<[1], [0], [0], [1], [0, 0, 1, 1], [], []>} : vector<8x64xbf16>, vector<64x64xbf16>, vector<8x64xf32> -> vector<8x64xf32>
    %20 = math.tanh %19 : vector<8x64xf32>
    %21 = arith.truncf %20 : vector<8x64xf32> to vector<8x64xbf16>
    %c4 = arith.constant 4 : index
    %c0_13 = arith.constant 0 : index
    %c0_14 = arith.constant 0 : index
    %22 = vector.load %arg1[%c4, %c0_13, %c0_14] : memref<5x64x64xbf16, #tpu.memory_space<vmem>>, vector<1x64x64xbf16>
    %23 = vector.shape_cast %22 : vector<1x64x64xbf16> to vector<64x64xbf16>
    %cst_15 = arith.constant dense<0.000000e+00> : vector<8x64xf32>
    %24 = tpu.matmul %21, %23, %cst_15 {dimension_numbers = #tpu.dot_dimension_numbers<[1], [0], [0], [1], [0, 0, 1, 1], [], []>} : vector<8x64xbf16>, vector<64x64xbf16>, vector<8x64xf32> -> vector<8x64xf32>
    %25 = math.tanh %24 : vector<8x64xf32>
    %26 = vector.extract_strided_slice %25 {offsets = [0, 0], sizes = [8, 5], strides = [1, 1]} : vector<8x64xf32> to vector<8x5xf32>
    %27 = math.exp %26 : vector<8x5xf32>
    %cst_16 = arith.constant dense<0.000000e+00> : vector<8xf32>
    %28 = vector.multi_reduction <add>, %27, %cst_16 [1] : vector<8x5xf32> to vector<8xf32>
    %29 = vector.shape_cast %28 : vector<8xf32> to vector<8x1xf32>
    %30 = tpu.reciprocal %29 {approx = true} : vector<8x1xf32> -> vector<8x1xf32>
    %31 = vector.broadcast %30 : vector<8x1xf32> to vector<8x5xf32>
    %32 = arith.mulf %27, %31 : vector<8x5xf32>
    %cst_17 = arith.constant 0.000000e+00 : f32
    %cst_18 = arith.constant 5.000000e-01 : f32
    %33 = vector.broadcast %cst_17 : f32 to vector<8x5xf32>
    %34 = arith.maximumf %33, %32 : vector<8x5xf32>
    %35 = vector.broadcast %cst_18 : f32 to vector<8x5xf32>
    %36 = arith.minimumf %35, %34 : vector<8x5xf32>
    %37 = arith.subf %32, %36 : vector<8x5xf32>
    %cst_19 = arith.constant dense<0.000000e+00> : vector<8xf32>
    %38 = vector.multi_reduction <add>, %37, %cst_19 [1] : vector<8x5xf32> to vector<8xf32>
    %39 = vector.shape_cast %38 : vector<8xf32> to vector<8x1xf32>
    %cst_20 = arith.constant 5.000000e-01 : f32
    %40 = vector.broadcast %cst_20 : f32 to vector<8x5xf32>
    %41 = arith.cmpf one, %36, %40 : vector<8x5xf32>
    %cst_21 = arith.constant 0.000000e+00 : f32
    %42 = vector.broadcast %cst_21 : f32 to vector<8x5xf32>
    %43 = arith.select %41, %36, %42 : vector<8x5xi1>, vector<8x5xf32>
    %cst_22 = arith.constant dense<0.000000e+00> : vector<8xf32>
    %44 = vector.multi_reduction <add>, %43, %cst_22 [1] : vector<8x5xf32> to vector<8xf32>
    %45 = vector.shape_cast %44 : vector<8xf32> to vector<8x1xf32>
    %cst_23 = arith.constant 1.000000e-30 : f32
    %46 = vector.broadcast %cst_23 : f32 to vector<8x1xf32>
    %47 = arith.maximumf %45, %46 : vector<8x1xf32>
    %48 = tpu.reciprocal %47 {approx = true} : vector<8x1xf32> -> vector<8x1xf32>
    %49 = arith.mulf %39, %48 : vector<8x1xf32>
    %50 = vector.broadcast %49 : vector<8x1xf32> to vector<8x5xf32>
    %51 = arith.mulf %50, %43 : vector<8x5xf32>
    %52 = arith.addf %36, %51 : vector<8x5xf32>
    %cst_24 = arith.constant 0.000000e+00 : f32
    %cst_25 = arith.constant 5.000000e-01 : f32
    %53 = vector.broadcast %cst_24 : f32 to vector<8x5xf32>
    %54 = arith.maximumf %53, %52 : vector<8x5xf32>
    %55 = vector.broadcast %cst_25 : f32 to vector<8x5xf32>
    %56 = arith.minimumf %55, %54 : vector<8x5xf32>
    %57 = arith.subf %52, %56 : vector<8x5xf32>
    %cst_26 = arith.constant dense<0.000000e+00> : vector<8xf32>
    %58 = vector.multi_reduction <add>, %57, %cst_26 [1] : vector<8x5xf32> to vector<8xf32>
    %59 = vector.shape_cast %58 : vector<8xf32> to vector<8x1xf32>
    %cst_27 = arith.constant 5.000000e-01 : f32
    %60 = vector.broadcast %cst_27 : f32 to vector<8x5xf32>
    %61 = arith.cmpf one, %56, %60 : vector<8x5xf32>
    %cst_28 = arith.constant 0.000000e+00 : f32
    %62 = vector.broadcast %cst_28 : f32 to vector<8x5xf32>
    %63 = arith.select %61, %56, %62 : vector<8x5xi1>, vector<8x5xf32>
    %cst_29 = arith.constant dense<0.000000e+00> : vector<8xf32>
    %64 = vector.multi_reduction <add>, %63, %cst_29 [1] : vector<8x5xf32> to vector<8xf32>
    %65 = vector.shape_cast %64 : vector<8xf32> to vector<8x1xf32>
    %cst_30 = arith.constant 1.000000e-30 : f32
    %66 = vector.broadcast %cst_30 : f32 to vector<8x1xf32>
    %67 = arith.maximumf %65, %66 : vector<8x1xf32>
    %68 = tpu.reciprocal %67 {approx = true} : vector<8x1xf32> -> vector<8x1xf32>
    %69 = arith.mulf %59, %68 : vector<8x1xf32>
    %70 = vector.broadcast %69 : vector<8x1xf32> to vector<8x5xf32>
    %71 = arith.mulf %70, %63 : vector<8x5xf32>
    %72 = arith.addf %56, %71 : vector<8x5xf32>
    %cst_31 = arith.constant 0.000000e+00 : f32
    %cst_32 = arith.constant 5.000000e-01 : f32
    %73 = vector.broadcast %cst_31 : f32 to vector<8x5xf32>
    %74 = arith.maximumf %73, %72 : vector<8x5xf32>
    %75 = vector.broadcast %cst_32 : f32 to vector<8x5xf32>
    %76 = arith.minimumf %75, %74 : vector<8x5xf32>
    %77 = arith.subf %72, %76 : vector<8x5xf32>
    %cst_33 = arith.constant dense<0.000000e+00> : vector<8xf32>
    %78 = vector.multi_reduction <add>, %77, %cst_33 [1] : vector<8x5xf32> to vector<8xf32>
    %79 = vector.shape_cast %78 : vector<8xf32> to vector<8x1xf32>
    %cst_34 = arith.constant 5.000000e-01 : f32
    %80 = vector.broadcast %cst_34 : f32 to vector<8x5xf32>
    %81 = arith.cmpf one, %76, %80 : vector<8x5xf32>
    %cst_35 = arith.constant 0.000000e+00 : f32
    %82 = vector.broadcast %cst_35 : f32 to vector<8x5xf32>
    %83 = arith.select %81, %76, %82 : vector<8x5xi1>, vector<8x5xf32>
    %cst_36 = arith.constant dense<0.000000e+00> : vector<8xf32>
    %84 = vector.multi_reduction <add>, %83, %cst_36 [1] : vector<8x5xf32> to vector<8xf32>
    %85 = vector.shape_cast %84 : vector<8xf32> to vector<8x1xf32>
    %cst_37 = arith.constant 1.000000e-30 : f32
    %86 = vector.broadcast %cst_37 : f32 to vector<8x1xf32>
    %87 = arith.maximumf %85, %86 : vector<8x1xf32>
    %88 = tpu.reciprocal %87 {approx = true} : vector<8x1xf32> -> vector<8x1xf32>
    %89 = arith.mulf %79, %88 : vector<8x1xf32>
    %90 = vector.broadcast %89 : vector<8x1xf32> to vector<8x5xf32>
    %91 = arith.mulf %90, %83 : vector<8x5xf32>
    %92 = arith.addf %76, %91 : vector<8x5xf32>
    %cst_38 = arith.constant 0.000000e+00 : f32
    %cst_39 = arith.constant 5.000000e-01 : f32
    %93 = vector.broadcast %cst_38 : f32 to vector<8x5xf32>
    %94 = arith.maximumf %93, %92 : vector<8x5xf32>
    %95 = vector.broadcast %cst_39 : f32 to vector<8x5xf32>
    %96 = arith.minimumf %95, %94 : vector<8x5xf32>
    %97 = vector.extract_strided_slice %0 {offsets = [0, 0], sizes = [8, 5], strides = [1, 1]} : vector<8x64xf32> to vector<8x5xf32>
    %98 = vector.extract_strided_slice %0 {offsets = [0, 5], sizes = [8, 1], strides = [1, 1]} : vector<8x64xf32> to vector<8x1xf32>
    %cst_40 = arith.constant 1.030000e+00 : f32
    %99 = vector.broadcast %cst_40 : f32 to vector<8x1xf32>
    %100 = arith.mulf %98, %99 : vector<8x1xf32>
    %101 = vector.broadcast %100 : vector<8x1xf32> to vector<8x5xf32>
    %102 = arith.mulf %101, %96 : vector<8x5xf32>
    %cst_41 = arith.constant 1.000000e+00 : f32
    %103 = vector.broadcast %cst_41 : f32 to vector<8x5xf32>
    %104 = arith.addf %103, %97 : vector<8x5xf32>
    %105 = arith.mulf %102, %104 : vector<8x5xf32>
    %cst_42 = arith.constant dense<0.000000e+00> : vector<8xf32>
    %106 = vector.multi_reduction <add>, %105, %cst_42 [1] : vector<8x5xf32> to vector<8xf32>
    %107 = vector.shape_cast %106 : vector<8xf32> to vector<8x1xf32>
    %c0_43 = arith.constant 0 : index
    %c0_44 = arith.constant 0 : index
    %108 = vector.load %arg2[%c0_43, %c0_44] : memref<8x1xf32, #tpu.memory_space<vmem>>, vector<8x1xf32>
    tpu.vector_store %arg2[%c0_43, %c0_44], %107 {strides = array<i32>} : memref<8x1xf32, #tpu.memory_space<vmem>>, vector<8x1xf32>,
    return
  }
}

</mosaic_0001>

<bundles_post_ra>
// kernel: subnetwork_forward.1
= control target key start
LH: loop header
LB: loop body
LE: loop exit
PB: predicated region body
PF: predicated region fallthrough
CT: control target
= control target key end

     0   :  { %7 = vsyncpa [#allocation3], 0  ;;  %s518_s12 = smov [#allocation2]   ;;  %s519_s14 = smov 64   ;;  %s565_s0 = inlined_call_operand.vmem [shape: f32[8,64], index: 0, kind: input, shape index: {}]   ;;  %s566_s1 = inlined_call_operand.hbm [shape: bf16[5,64,64], index: 1, kind: input, shape index: {}]   ;;  %s567_s2 = inlined_call_operand.vmem [shape: f32[8,1], index: 2, kind: output, shape index: {}]  }
   0x1   :  { %s14_s11 = sshll.u32 %s566_s1, 4  ;;  %s16_s13 = sshll.u32 %s518_s12, 4  ;;  %s15_s11 = int_to_ptr.hbm [resolvable:$true] %s14_s11  ;;  %s17_s13 = int_to_ptr.vmem [resolvable:$true] %s16_s13 }
   0x2   :  { %s520_s15 = smov 4  }
   0x3   :  { %22 = dma.hbm_to_vmem [thread:$0]  %s15_s11, 2560, %s17_s13, [#allocation3], %s519_s14, %s519_s14, %s520_s15  }
   0x4   :  { %516 = dma.done.wait [#allocation3], 2560  }
   0x5   :  { %517 = vsyncadd [#allocation3], 4294964736  ;;  %v449_v0 = vld [vmem:[#allocation2 + $0x18] sm:$0xff]  ;;  %v448_v2 = vld [vmem:[#allocation2 + $0x10] sm:$0xff]  ;;  %vm62_vm0 = vcmask 523264   ;;  %vm286_vm1 = vcmask 39936  }
   0x6   :  { %v453_v1 = vld [vmem:[#allocation2 + $0x38] sm:$0xff]  ;;  %70 = vmatpush.bf16.msra.mxu0 %v449_v0  ;;  %v452_v3 = vld [vmem:[#allocation2 + $0x30] sm:$0xff]  ;;  %v447_v4 = vld [vmem:[#allocation2 + $0x8] sm:$0xff]  ;;  %vm354_vm5 = vcmask 7168  }
   0x7   :  { %121 = vmatpush.bf16.msra.mxu1 %v453_v1  ;;  %v446_v5 = vld [vmem:[#allocation2] sm:$0xff]  ;;  %v451_v8 = vld [vmem:[#allocation2 + $0x28] sm:$0xff]  ;;  %v457_v10 = vld [vmem:[#allocation2 + $0x58] sm:$0xff] }
   0x8   :  { %v543_v6 = vld [vmem:[%s565_s0] sm:$0xff]  ;;  %172 = vmatpush.bf16.msra.mxu2 %v457_v10  ;;  %v456_v11 = vld [vmem:[#allocation2 + $0x50] sm:$0xff]  ;;  %v455_v16 = vld [vmem:[#allocation2 + $0x48] sm:$0xff] }
   0x9   :  { %v29_v7 = vpack.c.bf16 %v543_v6, %v543_v6  ;;  %v450_v9 = vld [vmem:[#allocation2 + $0x20] sm:$0xff]  ;;  %v461_v18 = vld [vmem:[#allocation2 + $0x78] sm:$0xff]  ;;  %v460_v19 = vld [vmem:[#allocation2 + $0x70] sm:$0xff] }
   0xa   :  { %71 = vmatpush.bf16.msra.mxu0 %v448_v2  ;;  %v454_v17 = vld [vmem:[#allocation2 + $0x40] sm:$0xff]  ;;  %223 = vmatpush.bf16.msra.mxu3 %v461_v18  ;;  %v459_v24 = vld [vmem:[#allocation2 + $0x68] sm:$0xff]  ;;  %v465_v26 = vld [vmem:[#allocation2 + $0x98] sm:$0xff]  ;;  %v342_v2 = vmul.f32 1.03, %v543_v6 }
   0xb   :  { %122 = vmatpush.bf16.msra.mxu1 %v452_v3  ;;  %v458_v25 = vld [vmem:[#allocation2 + $0x60] sm:$0xff]  ;;  %v464_v27 = vld [vmem:[#allocation2 + $0x90] sm:$0xff]  ;;  %v463_v32 = vld [vmem:[#allocation2 + $0x88] sm:$0xff]  ;;  %v521_v3 = vmov 5  }
   0xc   :  { %173 = vmatpush.bf16.msra.mxu2 %v456_v11  ;;  %v462_v33 = vld [vmem:[#allocation2 + $0x80] sm:$0xff]  ;;  %470 = vset.pattern.permute.xlu1 %v521_v3 }
   0xd   :  { %471 = vset.pattern.permute.xlu0 %v521_v3 }
   0xe   :  { %72 = vmatpush.bf16.msra.mxu0 %v447_v4  ;;  %224 = vmatpush.bf16.msra.mxu3 %v460_v19 }
   0xf   :  { %123 = vmatpush.bf16.msra.mxu1 %v451_v8 }
  0x10   :  { %174 = vmatpush.bf16.msra.mxu2 %v455_v16 }
  0x12   :  { %73 = vmatpush.bf16.msra.mxu0 %v446_v5  ;;  %225 = vmatpush.bf16.msra.mxu3 %v459_v24 }
  0x13   :  { %124 = vmatpush.bf16.msra.mxu1 %v450_v9 }
  0x14   :  { %175 = vmatpush.bf16.msra.mxu2 %v454_v17 }
  0x15   :  { %377 = vmatmul.msk.bf16.vlgmr.msra.gmra.mxu0 %vm62_vm0, %v29_v7 }
  0x16   :  { %226 = vmatpush.bf16.msra.mxu3 %v458_v25  ;;  %274 = vmatpush.bf16.msrb.mxu0 %v465_v26 }
  0x1a   :  { %275 = vmatpush.bf16.msrb.mxu0 %v464_v27 }
  0x1e   :  { %276 = vmatpush.bf16.msrb.mxu0 %v463_v32 }
  0x22   :  { %277 = vmatpush.bf16.msrb.mxu0 %v462_v33 }
  0x92   :  { %v75_v12 = vpop.f32.mrf.mxu0 }
  0x93   :  { %472 = vtanh.f32 %v75_v12 }
  0x99   :  { %v473_v13 = vpop.eup %472 }
  0x9a   :  { %v80_v14 = vpack.c.bf16 %v473_v13, %v473_v13  ;;  %v77_v15 = vpop.f32.mrf.mxu0 }
  0x9c   :  { %394 = vmatmul.msk.bf16.vlgmr.msra.gmra.mxu1 %vm62_vm0, %v80_v14 }
 0x119   :  { %v126_v20 = vpop.f32.mrf.mxu1 }
 0x11a   :  { %474 = vtanh.f32 %v126_v20 }
 0x120   :  { %v475_v21 = vpop.eup %474 }
 0x121   :  { %v131_v22 = vpack.c.bf16 %v475_v21, %v475_v21  ;;  %v128_v23 = vpop.f32.mrf.mxu1 }
 0x123   :  { %411 = vmatmul.msk.bf16.vlgmr.msra.gmra.mxu2 %vm62_vm0, %v131_v22 }
 0x1a6   :  { %v177_v28 = vpop.f32.mrf.mxu2 }
 0x1a7   :  { %476 = vtanh.f32 %v177_v28  ;;  %v349_v28 = vadd.f32 1.0, %v543_v6 }
 0x1ad   :  { %v477_v29 = vpop.eup %476 }
 0x1ae   :  { %v182_v30 = vpack.c.bf16 %v477_v29, %v477_v29  ;;  %v179_v31 = vpop.f32.mrf.mxu2 }
 0x1b0   :  { %428 = vmatmul.msk.bf16.vlgmr.msra.gmra.mxu3 %vm62_vm0, %v182_v30 }
 0x233   :  { %v228_v34 = vpop.f32.mrf.mxu3 }
 0x234   :  { %478 = vtanh.f32 %v228_v34 }
 0x23a   :  { %v479_v35 = vpop.eup %478 }
 0x23b   :  { %v233_v36 = vpack.c.bf16 %v479_v35, %v479_v35  ;;  %v230_v37 = vpop.f32.mrf.mxu3 }
 0x23d   :  { %445 = vmatmul.msk.bf16.vlgmr.msrb.gmra.mxu0 %vm62_vm0, %v233_v36 }
 0x2ba   :  { %v279_v38 = vpop.f32.mrf.mxu0 }
 0x2bb   :  { %480 = vtanh.f32 %v279_v38 }
 0x2c1   :  { %v481_v39 = vpop.eup %480 }
 0x2c2   :  { %v284_v40 = vmul.f32 1.442695, %v481_v39  ;;  %v281_v41 = vpop.f32.mrf.mxu0 }
 0x2c4   :  { %482 = vpow2.f32 %v284_v40 }
 0x2ca   :  { %v483_v42 = vpop.eup %482 }
 0x2cb   :  { %v287_v43 = vsel %vm286_vm1, %v483_v42, 0.0 }
 0x2cc   :  { %288 = vadd.xlane.f32.xlu0 %v287_v43 }
 0x33f   :  { %v289_v44 = vpop.xlane.xlu0 %288 }
 0x340   :  { %484 = vrcp.f32 %v289_v44 }
 0x346   :  { %v485_v45 = vpop.eup %484 }
 0x347   :  { %v291_v46 = vmul.f32 %v485_v45, %v483_v42 }
 0x349   :  { %v292_v47 = vmax.f32 %v291_v46, 0.0 }
 0x34b   :  { %v293_v48 = vmin.f32 %v292_v47, 0.5 }
 0x34d   :  { %vm298_vm2 = vcmp.ne.f32.partialorder %v293_v48, 0.5  ;;  %v294_v49 = vsub.f32 %v291_v46, %v293_v48 }
 0x34e   :  { %v299_v50 = vsel %vm298_vm2, %v293_v48, 0.0 }
 0x34f   :  { %v300_v51 = vsel %vm286_vm1, %v299_v50, 0.0  ;;  %v295_v52 = vsel %vm286_vm1, %v294_v49, 0.0 }
 0x350   :  { %301 = vadd.xlane.f32.xlu0 %v300_v51  ;;  %296 = vadd.xlane.f32.xlu1 %v295_v52 }
 0x3c3   :  { %v302_v53 = vpop.xlane.xlu0 %301  ;;  %v297_v56 = vpop.xlane.xlu1 %296 }
 0x3c4   :  { %v303_v54 = vmax.f32 %v302_v53, 1e-30 }
 0x3c6   :  { %486 = vrcp.f32 %v303_v54 }
 0x3cc   :  { %v487_v55 = vpop.eup %486 }
 0x3cd   :  { %v305_v57 = vmul.f32 %v487_v55, %v297_v56 }
 0x3cf   :  { %v306_v58 = vmul.f32 %v305_v57, %v299_v50 }
 0x3d1   :  { %v307_v59 = vadd.f32 %v306_v58, %v293_v48 }
 0x3d3   :  { %v308_v60 = vmax.f32 %v307_v59, 0.0 }
 0x3d5   :  { %v309_v61 = vmin.f32 %v308_v60, 0.5 }
 0x3d7   :  { %vm314_vm3 = vcmp.ne.f32.partialorder %v309_v61, 0.5  ;;  %v310_v62 = vsub.f32 %v307_v59, %v309_v61 }
 0x3d8   :  { %v315_v63 = vsel %vm314_vm3, %v309_v61, 0.0 }
 0x3d9   :  { %v316_v0 = vsel %vm286_vm1, %v315_v63, 0.0  ;;  %v311_v1 = vsel %vm286_vm1, %v310_v62, 0.0 }
 0x3da   :  { %317 = vadd.xlane.f32.xlu1 %v316_v0  ;;  %312 = vadd.xlane.f32.xlu2 %v311_v1 }
 0x3f3   :  { %345 = vperm.xlu1 %470, %v342_v2  }
 0x44d   :  { %v318_v4 = vpop.xlane.xlu1 %317  ;;  %v313_v8 = vpop.xlane.xlu2 %312 }
 0x44e   :  { %v319_v5 = vmax.f32 %v318_v4, 1e-30 }
 0x450   :  { %488 = vrcp.f32 %v319_v5 }
 0x456   :  { %v489_v7 = vpop.eup %488 }
 0x457   :  { %v321_v9 = vmul.f32 %v489_v7, %v313_v8 }
 0x459   :  { %v322_v10 = vmul.f32 %v321_v9, %v315_v63 }
 0x45b   :  { %v323_v11 = vadd.f32 %v322_v10, %v309_v61 }
 0x45d   :  { %v324_v12 = vmax.f32 %v323_v11, 0.0 }
 0x45f   :  { %v325_v13 = vmin.f32 %v324_v12, 0.5 }
 0x461   :  { %vm330_vm4 = vcmp.ne.f32.partialorder %v325_v13, 0.5  ;;  %v326_v14 = vsub.f32 %v323_v11, %v325_v13 }
 0x462   :  { %v331_v15 = vsel %vm330_vm4, %v325_v13, 0.0 }
 0x463   :  { %v332_v16 = vsel %vm286_vm1, %v331_v15, 0.0  ;;  %v327_v17 = vsel %vm286_vm1, %v326_v14, 0.0 }
 0x464   :  { %333 = vadd.xlane.f32.xlu2 %v332_v16  ;;  %328 = vadd.xlane.f32.xlu0 %v327_v17 }
 0x465   :  { %v346_v26 = vpop.permute.xlu1 %345 }
 0x4d7   :  { %v334_v18 = vpop.xlane.xlu2 %333  ;;  %v329_v21 = vpop.xlane.xlu0 %328 }
 0x4d8   :  { %v335_v19 = vmax.f32 %v334_v18, 1e-30 }
 0x4da   :  { %490 = vrcp.f32 %v335_v19 }
 0x4e0   :  { %v491_v20 = vpop.eup %490 }
 0x4e1   :  { %v337_v22 = vmul.f32 %v491_v20, %v329_v21 }
 0x4e3   :  { %v338_v23 = vmul.f32 %v337_v22, %v331_v15 }
 0x4e5   :  { %v339_v24 = vadd.f32 %v338_v23, %v325_v13 }
 0x4e7   :  { %v340_v25 = vmax.f32 %v339_v24, 0.0 }
 0x4e9   :  { %v341_v27 = vmin.f32 %v340_v25, 0.5 }
 0x4eb   :  { %v348_v29 = vmul.f32 %v346_v26, %v341_v27 }
 0x4ed   :  { %v350_v30 = vmul.f32 %v349_v28, %v348_v29 }
 0x4ef   :  { %v351_v31 = vsel %vm286_vm1, %v350_v30, 0.0 }
 0x4f0   :  { %352 = vadd.xlane.f32.xlu2 %v351_v31 }
 0x563   :  { %v353_v32 = vpop.xlane.xlu2 %352 }
 0x564   :  { %355 = vst.msk [vmem:[%s567_s2] sm:$0xff] %vm354_vm5, %v353_v32 }
 0x565   :  { %360 = vsyncpa [#allocation3], 1 }

</bundles_post_ra>
